<compile_context>
chip_gen: v7x
topology: tpu7x:2x2x1
jax: 0.10.0
libtpu: 0.0.40
codegen_flags: <defaults>
</compile_context>

<pallas_src>
import functools

import jax
import jax.numpy as jnp
from jax.experimental import pallas as pl
from jax.experimental.pallas import tpu as pltpu

EPS = 1e-5
_ROW_ALIGN = 16           # bf16 sublane packing is (16, 128): keep row tiles multiples of 16
_NUM_CORES = 2            # leading "parallel" grid axis -> v7x's 2 TensorCores split phase 1
_DEFAULT_TILE_ROWS = 16 * 1024


def _round_up(v, m):
    return (v + m - 1) // m * m


def _vmem_limit_bytes(tile_r, f_in, h):
    """Scoped-VMEM request for the chosen row tile (None -> keep the compiler default).

    Narrow (F_in / H wide) blocks are lane-padded to 128 in VMEM (4x inflation at F_in=32)
    and BlockSpec double-buffers every streamed operand, so the real footprint is much
    larger than the HBM bytes moved.  Stay under v7x's 64 MiB physical VMEM.
    """
    xw = _round_up(f_in, 128)
    hw = _round_up(h, 128)
    x_bufs = 2 * tile_r * xw * 4              # f32 x block, double buffered
    h_bufs = 2 * tile_r * hw * 2              # bf16 staged-h block, double buffered
    interm = tile_r * xw * 2 + tile_r * hw * 4  # in-kernel bf16 x copy + f32 h value
    need = x_bufs + h_bufs + interm + (8 << 20)
    if need <= (16 << 20):                    # fits every generation's default scoped window
        return None
    return min(need, 56 << 20)


# --------------------------------------------------------------------------- #
# Phase 1: h = x @ w1 + b1 (staged to HBM) + per-feature sum(h), sum(h*h)
# --------------------------------------------------------------------------- #
def stats_kernel(x_ref, w1_ref, b1_ref, h_ref, stats_ref, *,
                 n_rows, tile_r, tiles_per_core):
    # x_ref:     (tile_r, F_in)  f32    streamed row tile (read from HBM exactly once)
    # w1_ref:    (F_in, H)       bf16   resident
    # b1_ref:    (1, H)          f32    resident
    # h_ref:     (tile_r, H)     bf16   staged hidden activations for phase 2
    # stats_ref: (2, H)          f32    per-core accumulator (row 0: sum, row 1: sum of sq)
    c = pl.program_id(0)          # megacore shard
    t = pl.program_id(1)          # row tile within the shard

    @pl.when(t == 0)
    def _init():
        stats_ref[...] = jnp.zeros_like(stats_ref)

    # f32 -> bf16 cast done in-kernel (VPU has slack); the wrapper never materializes a
    # padded / bf16 copy of x in HBM.
    x = x_ref[...].astype(jnp.bfloat16)
    h = jnp.dot(x, w1_ref[...], preferred_element_type=jnp.float32) + b1_ref[...]
    h_bf = h.astype(jnp.bfloat16)
    h_ref[...] = h_bf

    # Mask ragged tail rows (and whole duplicate tiles on the last core) BEFORE the global
    # statistics accumulation.  Use where (select), not multiply: out-of-range data may be NaN.
    row0 = (c * tiles_per_core + t) * tile_r
    rows = row0 + jax.lax.broadcasted_iota(jnp.int32, (tile_r, 1), 0)
    hs = jnp.where(rows < n_rows, h_bf.astype(jnp.float32), 0.0)

    # Slice accumulation (no per-step concat relayout of the resident output block).
    stats_ref[0:1, :] += jnp.sum(hs, axis=0, keepdims=True)
    stats_ref[1:2, :] += jnp.sum(hs * hs, axis=0, keepdims=True)


# --------------------------------------------------------------------------- #
# Phase 2: fold BN stats into scale/shift, ReLU, (H -> 1) projection
# --------------------------------------------------------------------------- #
def apply_kernel(h_ref, stats_ref, params_ref, o_ref, *, n_rows):
    # h_ref:      (tile_r, H)           bf16  staged hidden activations
    # stats_ref:  (_NUM_CORES, 2, H)    f32   per-core stats partials (full block, resident)
    # params_ref: (4, H)                f32   rows: gamma, beta, w2, b2 (broadcast)
    # o_ref:      (tile_r, 1)           f32
    # Sum the per-core stats partials and fold BN into a per-feature scale/shift in-kernel
    # (H is tiny; recomputing per tile removes all intervening XLA ops between the phases).
    st = stats_ref[0]
    for ci in range(1, _NUM_CORES):
        st = st + stats_ref[ci]                                # (2, H)
    r = jnp.float32(n_rows)
    mean = st[0:1, :] / r
    # E[h^2] - mean^2 can go slightly negative from cancellation: clamp before rsqrt.
    var = jnp.maximum(st[1:2, :] / r - mean * mean, 0.0)

    gamma = params_ref[0:1, :]
    beta = params_ref[1:2, :]
    w2row = params_ref[2:3, :]
    b2 = params_ref[3:4, 0:1]
    scale = gamma * jax.lax.rsqrt(var + EPS)                   # EUP rsqrt
    shift = beta - mean * scale

    h = h_ref[...].astype(jnp.float32)
    hr = jnp.maximum(h * scale + shift, 0.0)                   # folded BN + ReLU
    # Width-1 projection on the VPU + lane reduce (a 1-column MXU matmul would be wasted).
    # Output stays (tile_r, 1): the known-good store layout; output bytes are tiny here.
    o_ref[...] = jnp.sum(hr * w2row, axis=-1, keepdims=True) + b2


def out_layer_forward(x, w1, b1, gamma, beta, w2, b2, *, tile_rows=_DEFAULT_TILE_ROWS):
    """x: (B, N, in_num) -> (B, N, 1). Matches OutLayer(layer_num=2) in train() mode."""
    B, N, F_in = x.shape
    H = w1.shape[0]
    R = B * N

    tile_r = min(_round_up(R, _ROW_ALIGN), _round_up(tile_rows, _ROW_ALIGN))
    num_tiles = pl.cdiv(R, tile_r)
    tiles_per_core = pl.cdiv(num_tiles, _NUM_CORES)
    staged_rows = _NUM_CORES * tiles_per_core * tile_r   # staged h incl. per-core padding
    vmem_limit = _vmem_limit_bytes(tile_r, F_in, H)

    x2 = x.reshape(R, F_in)                               # no pad / no dtype cast in wrapper
    w1_t = w1.T.astype(jnp.bfloat16)                      # (F_in, H), resident
    b1_row = b1.reshape(1, H).astype(jnp.float32)
    params = jnp.concatenate(
        [gamma.reshape(1, H).astype(jnp.float32),
         beta.reshape(1, H).astype(jnp.float32),
         w2.reshape(1, H).astype(jnp.float32),
         jnp.broadcast_to(b2.astype(jnp.float32).reshape(1, 1), (1, H))],
        axis=0)                                           # (4, H) packed per-feature params

    # ---------------- Phase 1: staged h + global BN statistics ----------------
    # x tiles beyond the last real tile (round-up on the last core) are clamped to the last
    # valid block so the DMA stays in-bounds; their rows are masked out of the statistics
    # and their h output lands in the padding region of h_staged (discarded).
    h_staged, stats = pl.pallas_call(
        functools.partial(stats_kernel, n_rows=R, tile_r=tile_r,
                          tiles_per_core=tiles_per_core),
        out_shape=(jax.ShapeDtypeStruct((staged_rows, H), jnp.bfloat16),
                   jax.ShapeDtypeStruct((_NUM_CORES, 2, H), jnp.float32)),
        grid=(_NUM_CORES, tiles_per_core),
        in_specs=[
            pl.BlockSpec((tile_r, F_in),
                         lambda c, t: (jnp.minimum(c * tiles_per_core + t,
                                                   num_tiles - 1), 0)),
            pl.BlockSpec((F_in, H), lambda c, t: (0, 0)),
            pl.BlockSpec((1, H), lambda c, t: (0, 0)),
        ],
        out_specs=(
            pl.BlockSpec((tile_r, H), lambda c, t: (c * tiles_per_core + t, 0)),
            pl.BlockSpec((None, 2, H), lambda c, t: (c, 0, 0)),   # per-core stats slice
        ),
        compiler_params=pltpu.CompilerParams(
            dimension_semantics=("parallel", "arbitrary"),
            vmem_limit_bytes=vmem_limit),
    )(x2, w1_t, b1_row)

    # ---------------- Phase 2: normalize + ReLU + projection (h only) ----------------
    out = pl.pallas_call(
        functools.partial(apply_kernel, n_rows=R),
        out_shape=jax.ShapeDtypeStruct((R, 1), jnp.float32),
        grid=(num_tiles,),
        in_specs=[
            pl.BlockSpec((tile_r, H), lambda i: (i, 0)),
            pl.BlockSpec((_NUM_CORES, 2, H), lambda i: (0, 0, 0)),
            pl.BlockSpec((4, H), lambda i: (0, 0)),
        ],
        out_specs=pl.BlockSpec((tile_r, 1), lambda i: (i, 0)),
        compiler_params=pltpu.CompilerParams(
            dimension_semantics=("parallel",),
            vmem_limit_bytes=vmem_limit),
    )(h_staged, stats, params)

    return out.reshape(B, N, 1)


def init_params(key, in_num, inter_num):
    # Deterministic init mimicking PyTorch nn.Linear default (uniform +/- 1/sqrt(fan_in)).
    k1, k2, k3, k4 = jax.random.split(key, 4)
    bound1 = 1.0 / jnp.sqrt(in_num)
    w1 = jax.random.uniform(k1, (inter_num, in_num), jnp.float32, -bound1, bound1)
    b1 = jax.random.uniform(k2, (inter_num,), jnp.float32, -bound1, bound1)
    bound2 = 1.0 / jnp.sqrt(inter_num)
    w2 = jax.random.uniform(k3, (1, inter_num), jnp.float32, -bound2, bound2)
    b2 = jax.random.uniform(k4, (1,), jnp.float32, -bound2, bound2)
    gamma = jnp.ones((inter_num,), jnp.float32)   # BatchNorm1d default affine
    beta = jnp.zeros((inter_num,), jnp.float32)
    return w1, b1, gamma, beta, w2, b2


if __name__ == "__main__":
    # OutLayer(in_num=32, node_num=8, layer_num=2, inter_num=16); x: (batch=2, node=8, in=32)
    B, N, in_num, inter_num = 2, 8, 32, 16
    H = inter_num
    key = jax.random.PRNGKey(0)
    kx, kp = jax.random.split(key)
    x = jax.random.normal(kx, (B, N, in_num), jnp.float32)
    w1, b1, gamma, beta, w2, b2 = init_params(kp, in_num, inter_num)

    out = jax.block_until_ready(out_layer_forward(x, w1, b1, gamma, beta, w2, b2))
    assert out.shape == (B, N, 1)

    # Reference 1: mirrors the kernel's precision policy exactly (bf16 matmul inputs,
    # bf16-staged h, f32 statistics/normalization) -> tight tolerance.
    xr = x.reshape(B * N, in_num).astype(jnp.bfloat16)
    hq = jnp.dot(xr, w1.T.astype(jnp.bfloat16), preferred_element_type=jnp.float32) + b1
    hq = hq.astype(jnp.bfloat16).astype(jnp.float32)
    r = jnp.float32(B * N)
    mean = jnp.sum(hq, axis=0, keepdims=True) / r
    var = jnp.maximum(jnp.sum(hq * hq, axis=0, keepdims=True) / r - mean * mean, 0.0)
    scale = gamma.reshape(1, H) * jax.lax.rsqrt(var + EPS)
    shift = beta.reshape(1, H) - mean * scale
    hrq = jnp.maximum(hq * scale + shift, 0.0)
    ref1 = (jnp.sum(hrq * w2.reshape(1, H), axis=-1, keepdims=True) + b2).reshape(B, N, 1)
    assert jnp.allclose(out, ref1, atol=5e-4, rtol=5e-4), "mismatch vs precision-matched reference"

    # Reference 2: pure float32 (PyTorch train-mode semantics); loose tolerance covers
    # the deliberate bf16 rounding of the first matmul / staged h.
    xf = x.reshape(B * N, in_num)
    hf = xf @ w1.T + b1
    mf = hf.mean(axis=0, keepdims=True)
    vf = ((hf - mf) ** 2).mean(axis=0, keepdims=True)
    hrf = jnp.maximum((hf - mf) / jnp.sqrt(vf + EPS) * gamma + beta, 0.0)
    ref32 = (jnp.sum(hrf * w2.reshape(1, H), axis=-1, keepdims=True) + b2).reshape(B, N, 1)
    assert jnp.allclose(out, ref32, atol=5e-2, rtol=5e-2), "mismatch vs f32 reference"

    print("KERNEL_OK")
</pallas_src>

<mosaic_0001>
module attributes {stable_mosaic.version = 11 : i64} {
  func.func @stats_kernel(%arg0: i32, %arg1: i32, %arg2: memref<16x32xf32, #tpu.memory_space<vmem>>, %arg3: memref<32x16xbf16, #tpu.memory_space<vmem>>, %arg4: memref<1x16xf32, #tpu.memory_space<vmem>>, %arg5: memref<16x16xbf16, #tpu.memory_space<vmem>>, %arg6: memref<1x2x16xf32, #tpu.memory_space<vmem>>) attributes {dimension_semantics = [#tpu.dimension_semantics<parallel>, #tpu.dimension_semantics<arbitrary>], iteration_bounds = array<i64: 2, 1>, scalar_prefetch = 0 : i64, scratch_operands = 0 : i64, tpu.core_type = #tpu.core_type<tc>, window_params = [{transform_indices = @transform_0, window_bounds = array<i64: 16, 32>}, {pipeline_mode = #tpu.pipeline_mode<synchronous>, transform_indices = @transform_1, window_bounds = array<i64: 32, 16>}, {pipeline_mode = #tpu.pipeline_mode<synchronous>, transform_indices = @transform_2, window_bounds = array<i64: 1, 16>}, {transform_indices = @transform_3, window_bounds = array<i64: 16, 16>}, {transform_indices = @transform_4, window_bounds = array<i64: 1, 2, 16>}]} {
    %c0_i32 = arith.constant 0 : i32
    %0 = arith.cmpi eq, %arg1, %c0_i32 : i32
    %1 = arith.extui %0 : i1 to i32
    %c0_i32_0 = arith.constant 0 : i32
    %2 = arith.cmpi ne, %1, %c0_i32_0 : i32
    scf.if %2 {
      %cst_23 = arith.constant 0.000000e+00 : f32
      %42 = vector.broadcast %cst_23 : f32 to vector<2x16xf32>
      %c0_24 = arith.constant 0 : index
      %c0_25 = arith.constant 0 : index
      %c0_26 = arith.constant 0 : index
      %43 = vector.load %arg6[%c0_24, %c0_25, %c0_26] : memref<1x2x16xf32, #tpu.memory_space<vmem>>, vector<1x2x16xf32>
      %44 = vector.shape_cast %43 : vector<1x2x16xf32> to vector<2x16xf32>
      %45 = vector.shape_cast %42 : vector<2x16xf32> to vector<1x2x16xf32>
      tpu.vector_store %arg6[%c0_24, %c0_25, %c0_26], %45 {strides = array<i32>} : memref<1x2x16xf32, #tpu.memory_space<vmem>>, vector<1x2x16xf32>,
    } else {
    }
    %c0 = arith.constant 0 : index
    %c0_1 = arith.constant 0 : index
    %3 = vector.load %arg2[%c0, %c0_1] : memref<16x32xf32, #tpu.memory_space<vmem>>, vector<16x32xf32>
    %4 = arith.truncf %3 : vector<16x32xf32> to vector<16x32xbf16>
    %c0_2 = arith.constant 0 : index
    %c0_3 = arith.constant 0 : index
    %5 = vector.load %arg3[%c0_2, %c0_3] : memref<32x16xbf16, #tpu.memory_space<vmem>>, vector<32x16xbf16>
    %cst = arith.constant dense<0.000000e+00> : vector<16x16xf32>
    %6 = tpu.matmul %4, %5, %cst {dimension_numbers = #tpu.dot_dimension_numbers<[1], [0], [0], [1], [0, 0, 1, 1], [], []>} : vector<16x32xbf16>, vector<32x16xbf16>, vector<16x16xf32> -> vector<16x16xf32>
    %c0_4 = arith.constant 0 : index
    %c0_5 = arith.constant 0 : index
    %7 = vector.load %arg4[%c0_4, %c0_5] : memref<1x16xf32, #tpu.memory_space<vmem>>, vector<1x16xf32>
    %8 = vector.broadcast %7 : vector<1x16xf32> to vector<16x16xf32>
    %9 = arith.addf %6, %8 : vector<16x16xf32>
    %10 = arith.truncf %9 : vector<16x16xf32> to vector<16x16xbf16>
    %c0_6 = arith.constant 0 : index
    %c0_7 = arith.constant 0 : index
    %11 = vector.load %arg5[%c0_6, %c0_7] : memref<16x16xbf16, #tpu.memory_space<vmem>>, vector<16x16xbf16>
    tpu.vector_store %arg5[%c0_6, %c0_7], %10 {strides = array<i32>} : memref<16x16xbf16, #tpu.memory_space<vmem>>, vector<16x16xbf16>,
    %c1_i32 = arith.constant 1 : i32
    %12 = arith.muli %arg0, %c1_i32 : i32
    %13 = arith.addi %12, %arg1 : i32
    %c16_i32 = arith.constant 16 : i32
    %14 = arith.muli %13, %c16_i32 : i32
    %15 = tpu.iota {dimensions = array<i32: 0>} : vector<16x1xi32>
    %16 = vector.broadcast %14 : i32 to vector<16x1xi32>
    %17 = arith.addi %16, %15 : vector<16x1xi32>
    %c16_i32_8 = arith.constant 16 : i32
    %18 = vector.broadcast %c16_i32_8 : i32 to vector<16x1xi32>
    %19 = arith.cmpi slt, %17, %18 : vector<16x1xi32>
    %20 = arith.extf %10 : vector<16x16xbf16> to vector<16x16xf32>
    %cst_9 = arith.constant 0.000000e+00 : f32
    %21 = vector.shape_cast %19 : vector<16x1xi1> to vector<16x1xi1>
    %22 = vector.broadcast %21 : vector<16x1xi1> to vector<16x16xi1>
    %23 = vector.broadcast %cst_9 : f32 to vector<16x16xf32>
    %24 = arith.select %22, %20, %23 : vector<16x16xi1>, vector<16x16xf32>
    %c0_10 = arith.constant 0 : index
    %c0_11 = arith.constant 0 : index
    %c0_12 = arith.constant 0 : index
    %25 = vector.load %arg6[%c0_10, %c0_11, %c0_12] : memref<1x2x16xf32, #tpu.memory_space<vmem>>, vector<1x1x16xf32>
    %26 = vector.shape_cast %25 : vector<1x1x16xf32> to vector<1x16xf32>
    %cst_13 = arith.constant dense<0.000000e+00> : vector<16xf32>
    %27 = vector.multi_reduction <add>, %24, %cst_13 [0] : vector<16x16xf32> to vector<16xf32>
    %28 = vector.shape_cast %27 : vector<16xf32> to vector<1x16xf32>
    %29 = arith.addf %26, %28 : vector<1x16xf32>
    %c0_14 = arith.constant 0 : index
    %c0_15 = arith.constant 0 : index
    %c0_16 = arith.constant 0 : index
    %30 = vector.load %arg6[%c0_14, %c0_15, %c0_16] : memref<1x2x16xf32, #tpu.memory_space<vmem>>, vector<1x1x16xf32>
    %31 = vector.shape_cast %30 : vector<1x1x16xf32> to vector<1x16xf32>
    %32 = vector.shape_cast %29 : vector<1x16xf32> to vector<1x1x16xf32>
    tpu.vector_store %arg6[%c0_14, %c0_15, %c0_16], %32 {strides = array<i32>} : memref<1x2x16xf32, #tpu.memory_space<vmem>>, vector<1x1x16xf32>,
    %c0_17 = arith.constant 0 : index
    %c1 = arith.constant 1 : index
    %c0_18 = arith.constant 0 : index
    %33 = vector.load %arg6[%c0_17, %c1, %c0_18] : memref<1x2x16xf32, #tpu.memory_space<vmem>>, vector<1x1x16xf32>
    %34 = vector.shape_cast %33 : vector<1x1x16xf32> to vector<1x16xf32>
    %35 = arith.mulf %24, %24 : vector<16x16xf32>
    %cst_19 = arith.constant dense<0.000000e+00> : vector<16xf32>
    %36 = vector.multi_reduction <add>, %35, %cst_19 [0] : vector<16x16xf32> to vector<16xf32>
    %37 = vector.shape_cast %36 : vector<16xf32> to vector<1x16xf32>
    %38 = arith.addf %34, %37 : vector<1x16xf32>
    %c0_20 = arith.constant 0 : index
    %c1_21 = arith.constant 1 : index
    %c0_22 = arith.constant 0 : index
    %39 = vector.load %arg6[%c0_20, %c1_21, %c0_22] : memref<1x2x16xf32, #tpu.memory_space<vmem>>, vector<1x1x16xf32>
    %40 = vector.shape_cast %39 : vector<1x1x16xf32> to vector<1x16xf32>
    %41 = vector.shape_cast %38 : vector<1x16xf32> to vector<1x1x16xf32>
    tpu.vector_store %arg6[%c0_20, %c1_21, %c0_22], %41 {strides = array<i32>} : memref<1x2x16xf32, #tpu.memory_space<vmem>>, vector<1x1x16xf32>,
    return
  }
  func.func @transform_0(%arg0: i32, %arg1: i32) -> (i32, i32) {
    %c1_i32 = arith.constant 1 : i32
    %0 = arith.muli %arg0, %c1_i32 : i32
    %1 = arith.addi %0, %arg1 : i32
    %c0_i32 = arith.constant 0 : i32
    %2 = arith.minsi %1, %c0_i32 : i32
    %c0_i32_0 = arith.constant 0 : i32
    %c0_i32_1 = arith.constant 0 : i32
    return %2, %c0_i32_0 : i32, i32
  }
  func.func @transform_1(%arg0: i32, %arg1: i32) -> (i32, i32) {
    %c0_i32 = arith.constant 0 : i32
    %c0_i32_0 = arith.constant 0 : i32
    %c0_i32_1 = arith.constant 0 : i32
    return %c0_i32, %c0_i32_0 : i32, i32
  }
  func.func @transform_2(%arg0: i32, %arg1: i32) -> (i32, i32) {
    %c0_i32 = arith.constant 0 : i32
    %c0_i32_0 = arith.constant 0 : i32
    %c0_i32_1 = arith.constant 0 : i32
    return %c0_i32, %c0_i32_0 : i32, i32
  }
  func.func @transform_3(%arg0: i32, %arg1: i32) -> (i32, i32) {
    %c1_i32 = arith.constant 1 : i32
    %0 = arith.muli %arg0, %c1_i32 : i32
    %1 = arith.addi %0, %arg1 : i32
    %c0_i32 = arith.constant 0 : i32
    %c0_i32_0 = arith.constant 0 : i32
    return %1, %c0_i32 : i32, i32
  }
  func.func @transform_4(%arg0: i32, %arg1: i32) -> (i32, i32, i32) {
    %c0_i32 = arith.constant 0 : i32
    %c0_i32_0 = arith.constant 0 : i32
    %c0_i32_1 = arith.constant 0 : i32
    return %arg0, %c0_i32, %c0_i32_0 : i32, i32, i32
  }
}

</mosaic_0001>

<bundles_post_ra>
// kernel: tpu_custom_call.1
= control target key start
LH: loop header
LB: loop body
LE: loop exit
PB: predicated region body
PF: predicated region fallthrough
CT: control target
= control target key end

     0   :  { %10 = vsyncpa [#allocation3], 0  ;;  %s842_s0 = inlined_call_operand.vmem [shape: f32[16,32], index: 0, kind: input, shape index: {}]   ;;  %s843_s1 = inlined_call_operand.vmem [shape: bf16[32,16], index: 1, kind: input, shape index: {}]   ;;  %s844_s2 = inlined_call_operand.vmem [shape: f32[1,16], index: 2, kind: input, shape index: {}]   ;;  %s845_s3 = inlined_call_operand.vmem [shape: bf16[32,16], index: 3, kind: output, shape index: {0}]   ;;  %s846_s4 = inlined_call_operand.hbm [shape: f32[2,2,16], index: 4, kind: output, shape index: {1}]  }
   0x1   :  { %12 = vsyncpa [#allocation3 + $0x1], 0  ;;  %s704_s15 = smov 0   ;;  %s706_s16 = smov 0  }
   0x2   :  { %s708_s17 = smov 0   ;;  %s710_s18 = smov 0  }
   0x3   :  { %s712_s19 = smov 0   ;;  %s714_s20 = smov 0  }
   0x4 LB: > { %s503_s21 = sadd.s32 4294967295, %s674_s20   ;;  %s504_s22 = sadd.s32 4294967294, %s674_s20   ;;  %s674_s20 = sphi %s714_s20, %s18_s20   ;;  %s670_s19 = sphi %s712_s19, %s853_s19   ;;  %s666_s18 = sphi %s710_s18, %s852_s18   ;;  %s662_s17 = sphi %s708_s17, %s851_s17   ;;  %s658_s16 = sphi %s706_s16, %s850_s16   ;;  %s654_s15 = sphi %s704_s15, %s849_s15  }
   0x5   : > { %s30_s23 = sadd.s32 1, %s670_s19  ;;  %s139_s24 = sadd.s32 1, %s662_s17 }
   0x6   : > { %p32_p0 = scmp.ge.s32.totalorder %s30_s23, 2  ;;  %p149_p1 = scmp.ne.s32.totalorder %s662_s17, %s658_s16 }
   0x7   : > { %p150_p2 = scmp.eq.s32.totalorder %s503_s21, 1  ;;  %p155_p3 = scmp.ne.s32.totalorder %s658_s16, %s654_s15 }
   0x8   : > { %s855_s23 = smov (%p32_p0, %s30_s23), 0  ;;  %p156_p5 = scmp.eq.s32.totalorder %s504_s22, 1 }
   0x9   : > { %p744_p4 = por %p150_p2, %p149_p1  ;;  %s136_s26 = ssub.s32 %s670_s19, %s855_s23 }
   0xa   : > { %p507_p6 = scmp.ge.s32.totalorder %s674_s20, 1  ;;  %p137_p7 = scmp.eq.s32.totalorder %s136_s26, 0 }
   0xb   : > { %p751_p8 = por %p156_p5, %p155_p3  ;;  %p195_p9 = scmp.lt.s32.totalorder %s674_s20, 3 }
   0xc   : > { %s757_s28 = scalar_select %p137_p7, %s662_s17, %s139_s24  }
   0xd   : > { %p196_p10 = pnand %p507_p6, %p195_p9 }
   0xe   : > { %v594_v0 = vld [vmem:[%s843_s1] sm:$0xff] (!%p196_p10)   ;;  %v676_v1 = vmov (!%p196_p10), 0.0   ;;  %v595_v2 = vld [vmem:[%s843_s1 + $0x8] sm:$0xff] (!%p196_p10)   ;;  %vm677_vm0 = vmmov (!%p196_p10), 0   ;;  %p231_p11 = scmp.lt.s32.totalorder (!%p196_p10), %s666_s18, 0  ;;  %vm283_vm1 = vcmask (!%p196_p10), 261120   ;;  %v341_v6 = vlaneseq (!%p196_p10) }
   0xf   : > { %199 = sbr.rel (%p196_p10) target bundleno = 287 (0x11f), region = 32  ;;  %529 = vmatprep.subr.bf16.mxu0 (!%p196_p10), %v676_v1  ;;  %533 = vmatprep.mubr.msk.bf16.mxu0 (!%p196_p10), %vm677_vm0, %v676_v1  ;;  %s227_s13 = sand.u32 (!%p196_p10), 1, %s658_s16   ;;  %vm255_vm2 = vcmask (!%p196_p10), 123904   ;;  %v513_v8 = vld [vmem:[%s844_s2] ss:$0 sm:$0xff] (!%p196_p10)  ;;  %vm336_vm3 = vcmask (!%p196_p10), 125952  }
  0x10   : > { %530 = vmatpush3.bf16.msra.mxu0 (!%p196_p10), %v594_v0  ;;  %s508_s14 = sshll.u32 (!%p196_p10), %s227_s13, 1  ;;  %s511_s22 = sshll.u32 (!%p196_p10), %s666_s18, 1  ;;  %v342_v7 = vshrl.u32 (!%p196_p10), %v341_v6, 7  ;;  %vm358_vm6 = vcmask (!%p196_p10), 130048   ;;  %vm369_vm7 = vcmask (!%p196_p10), 122880  }
  0x11   : > { %531 = vmatprep.subr.bf16.mxu0 (!%p196_p10), %v676_v1  ;;  %s773_s21 = scalar_lea.vmem (!%p196_p10), [#allocation2], %s508_s14  ;;  %p244_p13 = scmp.lt.s32.totalorder (!%p196_p10), %s511_s22, 3 }
  0x12   : > { %256 = vst.msk [vmem:[%s773_s21] sm:$0x3] (!%p196_p10), %vm255_vm2, %v676_v1  ;;  %s519_s24 = sshll.u32 (!%p196_p10), %s666_s18, 4  ;;  %v343_v9 = vadd.s32 (!%p196_p10), 8, %v342_v7  ;;  %s392_s14 = scalar_lea.sflag (!%p196_p10), [#allocation3], %s227_s13 }
  0x13   : > { %v344_v10 = vstv (!%p196_p10), %s519_s24 }
  0x14   : > { %532 = vmatpush3.bf16.msra.mxu0 (!%p196_p10), %v595_v2  ;;  %v345_v15 = vadd.s32 (!%p196_p10), %v344_v10, %v342_v7  ;;  %v346_v16 = vadd.s32 (!%p196_p10), %v344_v10, %v343_v9 }
  0x16   : > { %s232_s7 = scalar_select %p231_p11, %s666_s18, 0  ;;  %vm347_vm4 = vcmp.lt.s32.totalorder %v345_v15, 16  ;;  %vm348_vm5 = vcmp.lt.s32.totalorder %v346_v16, 16 }
  0x17   : > { %s859_s22 = smov (!%p244_p13, %s511_s22), 3 }
  0x18   : > { %s509_s8 = sshll.u32 %s232_s7, 1  ;;  %s512_s30 = sshll.u32 %s859_s22, 2 }
  0x19   : > { %p234_p12 = scmp.lt.s32.totalorder %s509_s8, 1  ;;  %s247_s7 = scalar_lea.vmem %s845_s3, %s512_s30  ;;  %v357_v43 = vld [vmem:[%s773_s21] sm:$0x1]  ;;  %v371_v46 = vld [vmem:[%s773_s21 + $0x1] sm:$0x1] }
  0x1b   : > { %s857_s8 = smov (!%p234_p12, %s509_s8), 1 }
  0x1c   : > { %s510_s9 = sshll.u32 %s857_s8, 3  ;;  %s521_s8 = sshll.u32 %s666_s18, 5 }
  0x1d   : > { %s237_s12 = scalar_lea.vmem %s842_s0, %s510_s9  ;;  %s410_s9 = sshll.u32 %s773_s21, 4  ;;  %s794_s9 = int_to_ptr.vmem [resolvable:$true] %s410_s9 }
  0x1e   : > { %v257_v3 = vld [vmem:[%s237_s12] sm:$0xff]  ;;  %v258_v4 = vld [vmem:[%s237_s12 + $0x8] sm:$0xff]  ;;  %s792_s12 = scalar_lea.hbm %s846_s4, %s521_s8  ;;  %s596_s22 = scalar_lea.vmem %s794_s9, 32 }
  0x1f   : > { %v259_v5 = vpack.c.bf16 %v258_v4, %v257_v3  ;;  %p597_p0 = scmp.ne.s32.totalorder %s794_s9, %s596_s22  ;;  %s678_s18 = smov [#allocation2]  }
  0x20   : > { %s600_s24 = sshll.u32 %s678_s18, 4  ;;  %s601_s24 = int_to_ptr.vmem [resolvable:$false] %s600_s24 }
  0x21   : > { %534 = vmatmul.mubr.msk.bf16.vlgmr.msra.gmra.mrb[0].mxu0 %vm283_vm1, %v259_v5  ;;  %p598_p1 = pnand %p597_p0, %p744_p4  ;;  %s602_s26 = scalar_lea.vmem %s601_s24, 64 }
  0x22   : > { %p603_p3 = scmp.lt.s32.totalorder %s794_s9, %s601_s24  ;;  %p604_p5 = scmp.lt.s32.totalorder %s602_s26, %s596_s22 }
  0x23   : > { %p599_p2 = pneg %p598_p1 }
  0x24   : > { %p605_p6 = por %p604_p5, %p603_p3 }
  0x26   : > { %p606_p7 = pnand %p605_p6, %p599_p2 }
  0xf4   : > { %v321_v11 = vpop.f32.mrb[0].mxu0 }
  0xf5   : > { %v322_v12 = vadd.f32 %v513_v8, %v321_v11  ;;  %v535_v13 = vpop.f32.mrb[1].mxu0 }
  0xf6   : > { %v324_v14 = vpop.f32.mrb[2].mxu0 }
  0xf7   : > { %v524_v17 = vpack.c.bf16 %v322_v12, %v322_v12  ;;  %v325_v18 = vadd.f32 %v513_v8, %v324_v14  ;;  %v536_v19 = vpop.f32.mrb[3].mxu0 }
  0xf9   : > { %337 = vst.msk [vmem:[%s247_s7] sm:$0xf] %vm336_vm3, %v524_v17  ;;  %v328_v20 = vpack.c.bf16 %v325_v18, %v322_v12  ;;  %v525_v21 = vpack.c.bf16 %v325_v18, %v325_v18 }
  0xfb   : > { %338 = vst.msk [vmem:[%s247_s7 + $0x4] sm:$0xf] %vm336_vm3, %v525_v21  ;;  %v349_v22 = vunpack.c.l.bf16 %v328_v20  ;;  %v350_v23 = vunpack.c.h.bf16 %v328_v20 }
  0xfd   : > { %v355_v24 = vsel %vm347_vm4, %v349_v22, 0.0  ;;  %v356_v25 = vsel %vm348_vm5, %v350_v23, 0.0 }
  0xfe   : > { %v359_v26 = vsel %vm358_vm6, %v355_v24, 0.0  ;;  %v360_v27 = vsel %vm358_vm6, %v356_v25, 0.0  ;;  %v372_v28 = vmul.f32 %v355_v24, %v355_v24  ;;  %v373_v29 = vmul.f32 %v356_v25, %v356_v25 }
  0xff   : > { %v361_v30 = vadd.f32 %v360_v27, %v359_v26 }
 0x100   : > { %v374_v31 = vsel %vm358_vm6, %v372_v28, 0.0  ;;  %v375_v32 = vsel %vm358_vm6, %v373_v29, 0.0 }
 0x101   : > { %v362_v33 = vrot.slane %v361_v30, 4  ;;  %v376_v34 = vadd.f32 %v375_v32, %v374_v31 }
 0x103   : > { %v363_v35 = vadd.f32 %v362_v33, %v361_v30  ;;  %v377_v36 = vrot.slane %v376_v34, 4 }
 0x105   : > { %v364_v37 = vrot.slane %v363_v35, 2  ;;  %v378_v38 = vadd.f32 %v377_v36, %v376_v34 }
 0x107   : > { %v365_v39 = vadd.f32 %v364_v37, %v363_v35  ;;  %v379_v40 = vrot.slane %v378_v38, 2 }
 0x109   : > { %v366_v41 = vrot.slane %v365_v39, 1  ;;  %v380_v42 = vadd.f32 %v379_v40, %v378_v38 }
 0x10b   : > { %v367_v44 = vadd.f32 %v366_v41, %v365_v39  ;;  %v381_v45 = vrot.slane %v380_v42, 1 }
 0x10d   : > { %v368_v47 = vadd.f32 %v367_v44, %v357_v43  ;;  %v382_v48 = vadd.f32 %v381_v45, %v380_v42 }
 0x10f   : > { %370 = vst.msk [vmem:[%s773_s21] sm:$0x1] %vm369_vm7, %v368_v47  ;;  %v383_v49 = vadd.f32 %v382_v48, %v371_v46 }
 0x111   : > { %384 = vst.msk [vmem:[%s773_s21 + $0x1] sm:$0x1] %vm369_vm7, %v383_v49 }
 0x112   : > { %609 = shalt.err (!%p606_p7)
}
 0x113   : > { %s610_s13 = scalar_lea.hbm %s792_s12, 32  ;;  %s614_s30 = scalar_lea.hbm %s846_s4, 64 }
 0x114   : > { %p611_p9 = scmp.ne.s32.totalorder %s792_s12, %s610_s13  ;;  %p615_p12 = scmp.lt.u32.totalorder %s792_s12, %s846_s4 }
 0x115   : > { %p616_p13 = scmp.lt.u32.totalorder %s614_s30, %s610_s13  ;;  %p618_p1 = scmp.lt.u32.totalorder %s610_s13, %s792_s12 }
 0x116   : > { %p612_p10 = pnand %p611_p9, %p744_p4 }
 0x117   : > { %p617_p0 = por %p616_p13, %p615_p12 }
 0x118   : > { %p613_p11 = pneg %p612_p10 }
 0x119   : > { %p619_p2 = por %p618_p1, %p617_p0 }
 0x11b   : > { %p620_p3 = pnand %p619_p2, %p613_p11 }
 0x11d   : > { %623 = shalt.err (!%p620_p3)
}
 0x11e   : > { %537 = dma.vmem_to_hbm [thread:$0]  (%p744_p4), %s794_s9, 32, %s792_s12, %s392_s14  }
 0x11f PF: > { %p543_p5 = scmp.ge.s32.totalorder %s674_s20, 2  ;;  %s431_s7 = sand.u32 1, %s654_s15  }
 0x120   : > { %s432_s8 = scalar_lea.sflag [#allocation3], %s431_s7 }
 0x121   : > { %p540_p6 = pnand %p543_p5, %p751_p8 }
 0x123   : > { %649 = dma.done.wait (!%p540_p6), %s432_s8, 32  }
 0x124   : > { %651 = vsyncadd (!%p540_p6), %s432_s8, 4294967264  ;;  %s18_s20 = sadd.s32 1, %s674_s20   ;;  %s849_s15 = smov %s658_s16 }
 0x125   : > { %p15_p7 = scmp.ge.s32.totalorder %s18_s20, 4   ;;  %s850_s16 = smov %s662_s17 }
 0x126   : > { %s851_s17 = smov %s757_s28  ;;  %s852_s18 = smov %s670_s19 }
 0x127   : > { %s853_s19 = smov %s855_s23  ;;  %17 = sbr.rel (!%p15_p7) target bundleno = 4 (0x4), region = 83 }
 0x12e   :  { %437 = vsyncpa [#allocation3], 1 }
 0x12f   :  { %439 = vsyncpa [#allocation3 + $0x1], 1 }

</bundles_post_ra>
